<compile_context>
chip_gen: v5e
topology: v5e:2x2
jax: 0.10.0
libtpu: 0.0.40
codegen_flags: <defaults>
</compile_context>

<pallas_src>
import jax
import jax.numpy as jnp
from jax.experimental import pallas as pl
from jax.experimental.pallas import tpu as pltpu


def _round_up(x, m):
    return ((x + m - 1) // m) * m


def category_encoder_kernel(cat_ref, emb_ref,
                            w1_ref, b1_ref,
                            w2_ref, b2_ref,
                            w_head_ref, b_head_ref,
                            out_ref):
    # Embedding lookup as one-hot @ table (MXU-friendly gather for small tables).
    cat = cat_ref[...]                                    # (block_b, 1) int32
    bb = cat.shape[0]
    num_cat = emb_ref.shape[0]
    iota = jax.lax.broadcasted_iota(jnp.int32, (bb, num_cat), 1)
    onehot = (cat == iota).astype(jnp.float32)            # (block_b, num_cat)
    x = jnp.dot(onehot, emb_ref[...],
                preferred_element_type=jnp.float32)       # (block_b, E)

    # category_encoder: Linear(E, E//2) -> ReLU -> Linear(E//2, D//2) -> ReLU
    h1 = jnp.dot(x, w1_ref[...], preferred_element_type=jnp.float32) + b1_ref[...]
    h1 = jnp.maximum(h1, 0.0)
    h2 = jnp.dot(h1, w2_ref[...], preferred_element_type=jnp.float32) + b2_ref[...]
    h2 = jnp.maximum(h2, 0.0)

    # Fused heads: [cat_wts | cat_biases] in a single (block_b, 2*D) matmul.
    out = jnp.dot(h2, w_head_ref[...],
                  preferred_element_type=jnp.float32) + b_head_ref[...]
    out_ref[...] = out.astype(out_ref.dtype)


def category_encoder_forward(categories, params, block_b=128):
    """categories: (B,) int32. Returns (cat_wt_vals, cat_b_vals), each (B, encoder_dim)."""
    emb, w1, b1, w2, b2, wwt, bwt, wb, bb_ = params
    B = int(categories.shape[0])
    E = emb.shape[1]
    D = wwt.shape[1]
    num_cat = emb.shape[0]

    # Fuse the two heads along the output dimension (2*D = lane-dense 128 for D=64).
    w_head = jnp.concatenate([wwt, wb], axis=1)           # (D//2, 2*D)
    b_head = jnp.concatenate([bwt, bb_], axis=1)          # (1, 2*D)

    # Batch tiling: big blocks for real batches; don't over-pad tiny ones.
    block_b = min(block_b, _round_up(B, 8))
    Bp = _round_up(B, block_b)
    cat2d = jnp.zeros((Bp, 1), jnp.int32).at[:B, 0].set(categories.astype(jnp.int32))
    grid = (Bp // block_b,)

    def resident(a):
        # Weights/tables: same block every grid step -> stays VMEM-resident.
        return pl.BlockSpec(a.shape, lambda i: (0, 0))

    weights = (emb, w1, b1, w2, b2, w_head, b_head)

    flops = 2 * Bp * (num_cat * E + E * (E // 2) + (E // 2) * (D // 2)
                      + (D // 2) * (2 * D))
    param_bytes = sum(int(a.size) * a.dtype.itemsize for a in weights)
    io_bytes = int(cat2d.size) * 4 + Bp * 2 * D * 4
    cost = pl.CostEstimate(flops=int(flops), transcendentals=0,
                           bytes_accessed=int(param_bytes + io_bytes))

    fused = pl.pallas_call(
        category_encoder_kernel,
        out_shape=jax.ShapeDtypeStruct((Bp, 2 * D), jnp.float32),
        grid=grid,
        in_specs=[pl.BlockSpec((block_b, 1), lambda i: (i, 0))]
                 + [resident(a) for a in weights],
        out_specs=pl.BlockSpec((block_b, 2 * D), lambda i: (i, 0)),
        compiler_params=pltpu.CompilerParams(
            dimension_semantics=("parallel",)),
        cost_estimate=cost,
    )(cat2d, *weights)

    cat_wt_vals = fused[:B, :D]
    cat_b_vals = fused[:B, D:2 * D]
    return cat_wt_vals, cat_b_vals


def make_params(key, num_categories, embedding_dim, encoder_dim):
    """Deterministic synthetic parameters (PyTorch-like uniform fan-in init)."""
    E, D = embedding_dim, encoder_dim
    ks = jax.random.split(key, 9)

    def lin(kw, kb, fan_in, fan_out):
        bound = 1.0 / jnp.sqrt(fan_in)
        w = jax.random.uniform(kw, (fan_in, fan_out), jnp.float32, -bound, bound)
        b = jax.random.uniform(kb, (1, fan_out), jnp.float32, -bound, bound)
        return w, b

    emb = jax.random.normal(ks[0], (num_categories, E), jnp.float32)
    w1, b1 = lin(ks[1], ks[2], E, E // 2)
    w2, b2 = lin(ks[3], ks[4], E // 2, D // 2)
    wwt, bwt = lin(ks[5], ks[6], D // 2, D)
    wb, bb = lin(ks[7], ks[8], D // 2, D)
    return (emb, w1, b1, w2, b2, wwt, bwt, wb, bb)


def reference_forward(categories, params):
    emb, w1, b1, w2, b2, wwt, bwt, wb, bb = params
    x = emb[categories]
    h1 = jnp.maximum(x @ w1 + b1, 0.0)
    h2 = jnp.maximum(h1 @ w2 + b2, 0.0)
    return h2 @ wwt + bwt, h2 @ wb + bb


if __name__ == "__main__":
    num_categories = 16
    embedding_dim = 32
    encoder_dim = 64
    batch = 8

    key = jax.random.PRNGKey(0)
    kp, kc = jax.random.split(key)
    params = make_params(kp, num_categories, embedding_dim, encoder_dim)
    categories = jax.random.randint(kc, (batch,), 0, num_categories, dtype=jnp.int32)

    wt_vals, b_vals = category_encoder_forward(categories, params)
    jax.block_until_ready((wt_vals, b_vals))

    ref_wt, ref_b = reference_forward(categories, params)
    assert wt_vals.shape == (batch, encoder_dim)
    assert b_vals.shape == (batch, encoder_dim)
    assert jnp.allclose(wt_vals, ref_wt, atol=1e-5, rtol=1e-5)
    assert jnp.allclose(b_vals, ref_b, atol=1e-5, rtol=1e-5)

    print("KERNEL_OK")
</pallas_src>

<mosaic_0001>
module attributes {stable_mosaic.version = 11 : i64} {
  func.func @category_encoder_kernel(%arg0: i32, %arg1: memref<8x1xi32, #tpu.memory_space<vmem>>, %arg2: memref<16x32xf32, #tpu.memory_space<vmem>>, %arg3: memref<32x16xf32, #tpu.memory_space<vmem>>, %arg4: memref<1x16xf32, #tpu.memory_space<vmem>>, %arg5: memref<16x32xf32, #tpu.memory_space<vmem>>, %arg6: memref<1x32xf32, #tpu.memory_space<vmem>>, %arg7: memref<32x128xf32, #tpu.memory_space<vmem>>, %arg8: memref<1x128xf32, #tpu.memory_space<vmem>>, %arg9: memref<8x128xf32, #tpu.memory_space<vmem>>) attributes {dimension_semantics = [#tpu.dimension_semantics<parallel>], iteration_bounds = array<i64: 1>, scalar_prefetch = 0 : i64, scratch_operands = 0 : i64, tpu.core_type = #tpu.core_type<tc>, window_params = [{transform_indices = @transform_0, window_bounds = array<i64: 8, 1>}, {pipeline_mode = #tpu.pipeline_mode<synchronous>, transform_indices = @transform_1, window_bounds = array<i64: 16, 32>}, {pipeline_mode = #tpu.pipeline_mode<synchronous>, transform_indices = @transform_2, window_bounds = array<i64: 32, 16>}, {pipeline_mode = #tpu.pipeline_mode<synchronous>, transform_indices = @transform_3, window_bounds = array<i64: 1, 16>}, {pipeline_mode = #tpu.pipeline_mode<synchronous>, transform_indices = @transform_4, window_bounds = array<i64: 16, 32>}, {pipeline_mode = #tpu.pipeline_mode<synchronous>, transform_indices = @transform_5, window_bounds = array<i64: 1, 32>}, {pipeline_mode = #tpu.pipeline_mode<synchronous>, transform_indices = @transform_6, window_bounds = array<i64: 32, 128>}, {pipeline_mode = #tpu.pipeline_mode<synchronous>, transform_indices = @transform_7, window_bounds = array<i64: 1, 128>}, {transform_indices = @transform_8, window_bounds = array<i64: 8, 128>}]} {
    %c0 = arith.constant 0 : index
    %c0_0 = arith.constant 0 : index
    %0 = vector.load %arg1[%c0, %c0_0] : memref<8x1xi32, #tpu.memory_space<vmem>>, vector<8x1xi32>
    %1 = tpu.iota {dimensions = array<i32: 1>} : vector<8x16xi32>
    %2 = vector.broadcast %0 : vector<8x1xi32> to vector<8x16xi32>
    %3 = arith.cmpi eq, %2, %1 : vector<8x16xi32>
    %4 = arith.extui %3 : vector<8x16xi1> to vector<8x16xi32>
    %5 = arith.sitofp %4 : vector<8x16xi32> to vector<8x16xf32>
    %c0_1 = arith.constant 0 : index
    %c0_2 = arith.constant 0 : index
    %6 = vector.load %arg2[%c0_1, %c0_2] : memref<16x32xf32, #tpu.memory_space<vmem>>, vector<16x32xf32>
    %cst = arith.constant dense<0.000000e+00> : vector<8x32xf32>
    %7 = tpu.matmul %5, %6, %cst {dimension_numbers = #tpu.dot_dimension_numbers<[1], [0], [0], [1], [0, 0, 1, 1], [], []>} : vector<8x16xf32>, vector<16x32xf32>, vector<8x32xf32> -> vector<8x32xf32>
    %c0_3 = arith.constant 0 : index
    %c0_4 = arith.constant 0 : index
    %8 = vector.load %arg3[%c0_3, %c0_4] : memref<32x16xf32, #tpu.memory_space<vmem>>, vector<32x16xf32>
    %cst_5 = arith.constant dense<0.000000e+00> : vector<8x16xf32>
    %9 = tpu.matmul %7, %8, %cst_5 {dimension_numbers = #tpu.dot_dimension_numbers<[1], [0], [0], [1], [0, 0, 1, 1], [], []>} : vector<8x32xf32>, vector<32x16xf32>, vector<8x16xf32> -> vector<8x16xf32>
    %c0_6 = arith.constant 0 : index
    %c0_7 = arith.constant 0 : index
    %10 = vector.load %arg4[%c0_6, %c0_7] : memref<1x16xf32, #tpu.memory_space<vmem>>, vector<1x16xf32>
    %11 = vector.broadcast %10 : vector<1x16xf32> to vector<8x16xf32>
    %12 = arith.addf %9, %11 : vector<8x16xf32>
    %cst_8 = arith.constant 0.000000e+00 : f32
    %13 = vector.broadcast %cst_8 : f32 to vector<8x16xf32>
    %14 = arith.maximumf %12, %13 : vector<8x16xf32>
    %c0_9 = arith.constant 0 : index
    %c0_10 = arith.constant 0 : index
    %15 = vector.load %arg5[%c0_9, %c0_10] : memref<16x32xf32, #tpu.memory_space<vmem>>, vector<16x32xf32>
    %cst_11 = arith.constant dense<0.000000e+00> : vector<8x32xf32>
    %16 = tpu.matmul %14, %15, %cst_11 {dimension_numbers = #tpu.dot_dimension_numbers<[1], [0], [0], [1], [0, 0, 1, 1], [], []>} : vector<8x16xf32>, vector<16x32xf32>, vector<8x32xf32> -> vector<8x32xf32>
    %c0_12 = arith.constant 0 : index
    %c0_13 = arith.constant 0 : index
    %17 = vector.load %arg6[%c0_12, %c0_13] : memref<1x32xf32, #tpu.memory_space<vmem>>, vector<1x32xf32>
    %18 = vector.broadcast %17 : vector<1x32xf32> to vector<8x32xf32>
    %19 = arith.addf %16, %18 : vector<8x32xf32>
    %cst_14 = arith.constant 0.000000e+00 : f32
    %20 = vector.broadcast %cst_14 : f32 to vector<8x32xf32>
    %21 = arith.maximumf %19, %20 : vector<8x32xf32>
    %c0_15 = arith.constant 0 : index
    %c0_16 = arith.constant 0 : index
    %22 = vector.load %arg7[%c0_15, %c0_16] : memref<32x128xf32, #tpu.memory_space<vmem>>, vector<32x128xf32>
    %cst_17 = arith.constant dense<0.000000e+00> : vector<8x128xf32>
    %23 = tpu.matmul %21, %22, %cst_17 {dimension_numbers = #tpu.dot_dimension_numbers<[1], [0], [0], [1], [0, 0, 1, 1], [], []>} : vector<8x32xf32>, vector<32x128xf32>, vector<8x128xf32> -> vector<8x128xf32>
    %c0_18 = arith.constant 0 : index
    %c0_19 = arith.constant 0 : index
    %24 = vector.load %arg8[%c0_18, %c0_19] : memref<1x128xf32, #tpu.memory_space<vmem>>, vector<1x128xf32>
    %25 = vector.broadcast %24 : vector<1x128xf32> to vector<8x128xf32>
    %26 = arith.addf %23, %25 : vector<8x128xf32>
    %c0_20 = arith.constant 0 : index
    %c0_21 = arith.constant 0 : index
    %27 = vector.load %arg9[%c0_20, %c0_21] : memref<8x128xf32, #tpu.memory_space<vmem>>, vector<8x128xf32>
    tpu.vector_store %arg9[%c0_20, %c0_21], %26 {strides = array<i32>} : memref<8x128xf32, #tpu.memory_space<vmem>>, vector<8x128xf32>,
    return
  }
  func.func @transform_0(%arg0: i32) -> (i32, i32) {
    %c0_i32 = arith.constant 0 : i32
    %c0_i32_0 = arith.constant 0 : i32
    return %arg0, %c0_i32 : i32, i32
  }
  func.func @transform_1(%arg0: i32) -> (i32, i32) {
    %c0_i32 = arith.constant 0 : i32
    %c0_i32_0 = arith.constant 0 : i32
    %c0_i32_1 = arith.constant 0 : i32
    return %c0_i32, %c0_i32_0 : i32, i32
  }
  func.func @transform_2(%arg0: i32) -> (i32, i32) {
    %c0_i32 = arith.constant 0 : i32
    %c0_i32_0 = arith.constant 0 : i32
    %c0_i32_1 = arith.constant 0 : i32
    return %c0_i32, %c0_i32_0 : i32, i32
  }
  func.func @transform_3(%arg0: i32) -> (i32, i32) {
    %c0_i32 = arith.constant 0 : i32
    %c0_i32_0 = arith.constant 0 : i32
    %c0_i32_1 = arith.constant 0 : i32
    return %c0_i32, %c0_i32_0 : i32, i32
  }
  func.func @transform_4(%arg0: i32) -> (i32, i32) {
    %c0_i32 = arith.constant 0 : i32
    %c0_i32_0 = arith.constant 0 : i32
    %c0_i32_1 = arith.constant 0 : i32
    return %c0_i32, %c0_i32_0 : i32, i32
  }
  func.func @transform_5(%arg0: i32) -> (i32, i32) {
    %c0_i32 = arith.constant 0 : i32
    %c0_i32_0 = arith.constant 0 : i32
    %c0_i32_1 = arith.constant 0 : i32
    return %c0_i32, %c0_i32_0 : i32, i32
  }
  func.func @transform_6(%arg0: i32) -> (i32, i32) {
    %c0_i32 = arith.constant 0 : i32
    %c0_i32_0 = arith.constant 0 : i32
    %c0_i32_1 = arith.constant 0 : i32
    return %c0_i32, %c0_i32_0 : i32, i32
  }
  func.func @transform_7(%arg0: i32) -> (i32, i32) {
    %c0_i32 = arith.constant 0 : i32
    %c0_i32_0 = arith.constant 0 : i32
    %c0_i32_1 = arith.constant 0 : i32
    return %c0_i32, %c0_i32_0 : i32, i32
  }
  func.func @transform_8(%arg0: i32) -> (i32, i32) {
    %c0_i32 = arith.constant 0 : i32
    %c0_i32_0 = arith.constant 0 : i32
    return %arg0, %c0_i32 : i32, i32
  }
}

</mosaic_0001>

<bundles_post_ra>
// kernel: tpu_custom_call.1
= control target key start
LH: loop header
LB: loop body
LE: loop exit
PB: predicated region body
PF: predicated region fallthrough
CT: control target
= control target key end

     0   :  { %13 = vsyncpa [#allocation3], 0  ;;  %s363_s0 = inlined_call_operand.vmem [shape: s32[8,1], index: 0, kind: input, shape index: {}]   ;;  %s364_s1 = inlined_call_operand.vmem [shape: f32[16,32], index: 1, kind: input, shape index: {}]   ;;  %s365_s2 = inlined_call_operand.vmem [shape: f32[32,16], index: 2, kind: input, shape index: {}]   ;;  %s366_s3 = inlined_call_operand.vmem [shape: f32[1,16], index: 3, kind: input, shape index: {}]   ;;  %s367_s4 = inlined_call_operand.hbm [shape: f32[16,32], index: 4, kind: input, shape index: {}]   ;;  %s368_s5 = inlined_call_operand.vmem [shape: f32[1,32], index: 5, kind: input, shape index: {}]   ;;  %s369_s6 = inlined_call_operand.vmem [shape: f32[32,128], index: 6, kind: input, shape index: {}]   ;;  %s370_s7 = inlined_call_operand.vmem [shape: f32[1,128], index: 7, kind: input, shape index: {}]   ;;  %s371_s8 = inlined_call_operand.hbm [shape: f32[8,128], index: 8, kind: output, shape index: {}]  }
   0x1   :  { %14 = vsyncpa [#allocation4], 0  ;;  %s27_s29 = sshll.u32 %s367_s4, 4  ;;  %s260_s30 = smov [#allocation2]   ;;  %s28_s29 = int_to_ptr.hbm [resolvable:$true] %s27_s29 }
   0x2   :  { %s29_s9 = sshll.u32 %s260_s30, 4  ;;  %s261_s10 = smov 128   ;;  %s30_s9 = int_to_ptr.vmem [resolvable:$true] %s29_s9 }
   0x3   :  { %s262_s11 = smov 8  }
   0x4   :  { %35 = dma.hbm_to_vmem [thread:$0]  %s28_s29, 256, %s30_s9, [#allocation3], %s261_s10, %s261_s10, %s262_s11  }
   0x5   :  { %256 = dma.done.wait [#allocation3], 256  }
   0x6   :  { %257 = vsyncadd [#allocation3], 4294967040  ;;  %v263_v0 = vmov 0   ;;  %v46_v1 = vld [vmem:[%s363_s0] sm:$0xff]  ;;  %v56_v2 = vld [vmem:[%s364_s1 + $0x8] sm:$0xff]  ;;  %v47_v7 = vlaneseq  ;;  %vm57_vm0 = vcmask 130048  }
   0x7   :  { %204 = vset.pattern.permute.xlu0 %v263_v0  ;;  %75 = vmatpush.msra.mxu0 %v56_v2  ;;  %v55_v3 = vld [vmem:[%s364_s1] sm:$0xff]  ;;  %v84_v4 = vld [vmem:[%s365_s2 + $0x18] sm:$0xff]  ;;  %v83_v5 = vld [vmem:[%s365_s2 + $0x10] sm:$0xff]  ;;  %v264_v10 = vmov 0.0   ;;  %vm89_vm2 = vcmask 261120   ;;  %s265_s13 = smov [#allocation5]  }
   0x8   :  { %50 = vperm.xlu0 %204, %v46_v1   ;;  %105 = vmatpush.msra.mxu1 %v84_v4  ;;  %v82_v6 = vld [vmem:[%s365_s2 + $0x8] sm:$0xff]  ;;  %v48_v8 = vand.u32 127, %v47_v7  ;;  %v81_v12 = vld [vmem:[%s365_s2] sm:$0xff]  ;;  %v147_v16 = vld [vmem:[%s369_s6 + $0x18] sm:$0xff]  ;;  %s181_s14 = sshll.u32 %s265_s13, 4  ;;  %s182_s14 = int_to_ptr.vmem [resolvable:$true] %s181_s14 }
   0x9   :  { %76 = vmatpush.msra.mxu0 %v55_v3  ;;  %v115_v14 = vld [vmem:[#allocation2 + $0x8] sm:$0xff]  ;;  %v114_v15 = vld [vmem:[#allocation2] sm:$0xff]  ;;  %167 = vmatpush.msra.mxu3 %v147_v16  ;;  %v146_v21 = vld [vmem:[%s369_s6 + $0x10] sm:$0xff] }
   0xa   :  { %106 = vmatpush.msra.mxu1 %v83_v5  ;;  %137 = vmatpush.msra.mxu2 %v115_v14  ;;  %v205_v17 = vld [vmem:[%s366_s3] ss:$0 sm:$0xff]  ;;  %v145_v22 = vld [vmem:[%s369_s6 + $0x8] sm:$0xff] }
   0xb   :  { %168 = vmatpush.msra.mxu3 %v146_v21  ;;  %v144_v23 = vld [vmem:[%s369_s6] sm:$0xff]  ;;  %s183_s6 = sshll.u32 %s371_s8, 4  ;;  %s184_s6 = int_to_ptr.hbm [resolvable:$true] %s183_s6 }
   0xc   :  { %107 = vmatpush.msra.mxu1 %v82_v6  ;;  %138 = vmatpush.msra.mxu2 %v114_v15  ;;  %v206_v24 = vld [vmem:[%s368_s5] ss:$0 sm:$0xff] }
   0xd   :  { %169 = vmatpush.msra.mxu3 %v145_v22  ;;  %v207_v28 = vld [vmem:[%s370_s7] ss:$0 sm:$0xff] }
   0xe   :  { %108 = vmatpush.msra.mxu1 %v81_v12 }
   0xf   :  { %170 = vmatpush.msra.mxu3 %v144_v23 }
  0x7a   :  { %v51_v9 = vpop.permute.xlu0 %50 }
  0x7b   :  { %vm52_vm1 = vcmp.eq.s32.totalorder %v51_v9, %v48_v8 }
  0x7c   :  { %v193_v11 = vsel %vm52_vm1, 1.0, %v264_v10 }
  0x7d   :  { %194 = vmatmul.msk.f32.vlgmr.msra.gmra.mxu0 %vm57_vm0, %v193_v11 }
  0xfa   :  { %v78_v13 = vpop.f32.mrf.mxu0 }
  0xfb   :  { %195 = vmatmul.msk.f32.vlgmr.msra.gmra.mxu1 %vm89_vm2, %v78_v13 }
 0x178   :  { %v110_v18 = vpop.f32.mrf.mxu1 }
 0x179   :  { %v111_v19 = vadd.f32 %v205_v17, %v110_v18 }
 0x17b   :  { %v113_v20 = vmax.f32 %v111_v19, 0.0 }
 0x17d   :  { %196 = vmatmul.msk.f32.vlgmr.msra.gmra.mxu2 %vm57_vm0, %v113_v20 }
 0x200   :  { %v140_v25 = vpop.f32.mrf.mxu2 }
 0x201   :  { %v141_v26 = vadd.f32 %v206_v24, %v140_v25 }
 0x203   :  { %v143_v27 = vmax.f32 %v141_v26, 0.0 }
 0x205   :  { %197 = vmatmul.msk.f32.vlgmr.msra.gmra.mxu3 %vm89_vm2, %v143_v27 }
 0x288   :  { %v172_v29 = vpop.f32.mrf.mxu3 }
 0x289   :  { %v173_v30 = vadd.f32 %v207_v28, %v172_v29 }
 0x28b   :  { %175 = vst [vmem:[#allocation5] sm:$0xff] %v173_v30 }
 0x28c   :  { %186 = dma.vmem_to_hbm [thread:$0]  %s182_s14, 128, %s184_s6, [#allocation4]  }
 0x28d   :  { %258 = dma.done.wait [#allocation4], 128  }
 0x28e   :  { %259 = vsyncadd [#allocation4], 4294967168 }
 0x28f   :  { %191 = vsyncpa [#allocation3], 1 }
 0x290   :  { %192 = vsyncpa [#allocation4], 1 }

</bundles_post_ra>
